<compile_context>
chip_gen: v5e
topology: v5e:2x2
jax: 0.10.0
libtpu: 0.0.40
codegen_flags: <defaults>
</compile_context>

<pallas_src>
import jax
import jax.numpy as jnp
from jax.experimental import pallas as pl
from jax.experimental.pallas import tpu as pltpu

IN_PLANES = 1024   # self.in_planes in the PyTorch module
LANE = 128
SUBLANE = 8


def _round_up(x, m):
    return ((x + m - 1) // m) * m


def _cdiv(a, b):
    return (a + b - 1) // b


def _tpu_budget():
    """Return (vmem_capacity_bytes, assumed tensorcores/chip) with a safe fallback."""
    try:
        info = pltpu.get_tpu_info()
        vmem = int(info.vmem_capacity_bytes)
    except Exception:
        vmem = 64 * 1024 * 1024          # conservative (v7x-sized) fallback
    # v7x: 64 MiB VMEM per TC, 2 TCs/chip.  v5e/v6e: 128 MiB, 1 TC.
    n_cores = 2 if vmem <= 64 * 1024 * 1024 else 1
    return vmem, n_cores


def tri_tunnel_kernel(xp_ref, wsum_ref, bsum_ref, wfc_ref, bfc_ref, out_ref):
    # xp: (tile, C_in) pooled input features (bf16).  Two MXU matmuls with f32
    # accumulation; bias adds and the final store stay f32 on the VPU.
    feat = jnp.dot(xp_ref[...], wsum_ref[...],
                   preferred_element_type=jnp.float32)        # (tile, 1024)
    feat = feat + bsum_ref[...]                               # + (b1+b2+b3)
    logits = jnp.dot(feat.astype(wfc_ref.dtype), wfc_ref[...],
                     preferred_element_type=jnp.float32)      # (tile, Cpad)
    out_ref[...] = logits + bfc_ref[...]


def tri_tunnel_net(x_nchw, params, datatype, *, tile_n=None,
                   compute_dtype=jnp.bfloat16):
    N, C, H, W = x_nchw.shape
    assert H == 4 and W == 4, "branch feature map must be 4x4 (in_planes=1024)"

    # F.avg_pool2d(out, 4) on a 4x4 map == full spatial mean; the mean commutes
    # with the (1x1-conv) branches, so pool the *input* here, in f32, directly
    # on NCHW (no transpose, 16x smaller kernel input).
    pooled = jnp.mean(x_nchw.astype(jnp.float32), axis=(2, 3))      # (N, C) f32
    pooled = pooled.astype(compute_dtype)

    # Fold the three branches: out1+out2+out3 == x @ (w1+w2+w3) + (b1+b2+b3).
    w1, b1 = params['branch1']
    w2, b2 = params['branch2']
    w3, b3 = params['branch3']
    w_sum = (w1 + w2 + w3).astype(compute_dtype)                    # (C, 1024)
    b_sum = (b1 + b2 + b3).astype(jnp.float32).reshape(1, IN_PLANES)

    fc_key = {'oxford102flowers': 'fc1', 'cifar': 'fc2', 'imagenet': 'fc3'}
    if datatype not in fc_key:
        raise ValueError(f"unknown datatype: {datatype}")
    wfc, bfc = params[fc_key[datatype]]

    num_classes = wfc.shape[1]
    c_pad = _round_up(num_classes, LANE)              # 102/100 -> 128, 1000 -> 1024
    wfc_p = jnp.pad(wfc.astype(compute_dtype), ((0, 0), (0, c_pad - num_classes)))
    bfc_p = jnp.pad(bfc.astype(jnp.float32).reshape(1, num_classes),
                    ((0, 0), (0, c_pad - num_classes)))

    # ---- generation-aware tiling -------------------------------------------
    vmem_cap, n_cores = _tpu_budget()
    small_vmem = vmem_cap <= 64 * 1024 * 1024
    vmem_limit = (48 if small_vmem else 96) * 1024 * 1024
    if tile_n is None:
        tile_n = 512 if small_vmem else 1024

    # Balanced batch tiles: padding waste < 8 rows/tile; on a 2-TC chip give
    # the "parallel" axis at least n_cores tiles to shard when N is big enough.
    num_tiles = max(1, _cdiv(N, tile_n))
    if n_cores > 1 and num_tiles < n_cores and N > n_cores * SUBLANE:
        num_tiles = n_cores
    tile = _round_up(_cdiv(N, num_tiles), SUBLANE)

    def _footprint(t):                       # conservative: everything double-buffered
        x_bytes = 2 * t * C * 2
        out_bytes = 2 * t * c_pad * 4
        w_bytes = 2 * (C * IN_PLANES * 2 + IN_PLANES * 4
                       + IN_PLANES * c_pad * 2 + c_pad * 4)
        return x_bytes + out_bytes + w_bytes

    budget = vmem_limit - 4 * 1024 * 1024
    while tile > SUBLANE and _footprint(tile) > budget:
        tile = max(SUBLANE, _round_up(tile // 2, SUBLANE))
    num_tiles = _cdiv(N, tile)
    tile = _round_up(_cdiv(N, num_tiles), SUBLANE)    # rebalance (never grows tile)
    n_pad = tile * num_tiles

    x_p = pooled
    if n_pad != N:
        x_p = jnp.pad(x_p, ((0, n_pad - N), (0, 0)))

    def _run(single_buffer_weights):
        # Weights/biases are grid-invariant; on small-VMEM chips skip their
        # second pipeline buffer.
        wkw = {'pipeline_mode': pl.Buffered(1)} if single_buffer_weights else {}
        grid_spec = pltpu.PrefetchScalarGridSpec(
            num_scalar_prefetch=0,
            grid=(num_tiles,),
            in_specs=[
                # pooled input tiles stream through the pipeline
                pl.BlockSpec((tile, C), lambda i: (i, 0)),
                # weights / biases pinned resident across the whole grid
                pl.BlockSpec((C, IN_PLANES), lambda i: (0, 0), **wkw),
                pl.BlockSpec((1, IN_PLANES), lambda i: (0, 0), **wkw),
                pl.BlockSpec((IN_PLANES, c_pad), lambda i: (0, 0), **wkw),
                pl.BlockSpec((1, c_pad), lambda i: (0, 0), **wkw),
            ],
            out_specs=pl.BlockSpec((tile, c_pad), lambda i: (i, 0)),
        )
        return pl.pallas_call(
            tri_tunnel_kernel,
            out_shape=jax.ShapeDtypeStruct((n_pad, c_pad), jnp.float32),
            grid_spec=grid_spec,
            compiler_params=pltpu.CompilerParams(
                dimension_semantics=("parallel",),   # shard batch tiles across TCs
                vmem_limit_bytes=vmem_limit,
            ),
        )(x_p, w_sum, b_sum, wfc_p, bfc_p)

    want_single_buffer = small_vmem
    if want_single_buffer:
        try:
            out = _run(True)
            out = jax.block_until_ready(out)
        except Exception:
            out = _run(False)                 # fall back to default buffering
    else:
        out = _run(False)

    return out[:N, :num_classes]


def tri_tunnel_ref(x_nchw, params, datatype):
    """Pure-JAX f32 reference with the original (unfused) module semantics."""
    N, C, H, W = x_nchw.shape
    x = jnp.transpose(x_nchw, (0, 2, 3, 1)).reshape(N, H * W, C).astype(jnp.float32)

    def branch(wb):
        w, b = wb
        return jnp.einsum('nsc,cd->nsd', x, w.astype(jnp.float32)) + b

    out = branch(params['branch1']) + branch(params['branch2']) + branch(params['branch3'])
    pooled = jnp.mean(out, axis=1)            # avg_pool2d(4) on a 4x4 map
    key = {'oxford102flowers': 'fc1', 'cifar': 'fc2', 'imagenet': 'fc3'}[datatype]
    wfc, bfc = params[key]
    return pooled @ wfc.astype(jnp.float32) + bfc


def init_params(key, c_in):
    """Deterministic synthetic parameters (uniform, Kaiming-style scaling)."""
    ks = jax.random.split(key, 12)

    def u(k, fan_in, shape):
        bound = 1.0 / jnp.sqrt(jnp.float32(fan_in))
        return jax.random.uniform(k, shape, jnp.float32, -bound, bound)

    return {
        # 1x1 conv branches, stored as (C_in, 1024) = transpose of torch (out,in,1,1)
        'branch1': (u(ks[0], c_in, (c_in, IN_PLANES)), u(ks[1], c_in, (IN_PLANES,))),
        'branch2': (u(ks[2], c_in, (c_in, IN_PLANES)), u(ks[3], c_in, (IN_PLANES,))),
        'branch3': (u(ks[4], c_in, (c_in, IN_PLANES)), u(ks[5], c_in, (IN_PLANES,))),
        # fc heads, stored as (1024, out) = transpose of torch nn.Linear weight
        'fc1': (u(ks[6], IN_PLANES, (IN_PLANES, 102)), u(ks[7], IN_PLANES, (102,))),
        'fc2': (u(ks[8], IN_PLANES, (IN_PLANES, 100)), u(ks[9], IN_PLANES, (100,))),
        'fc3': (u(ks[10], IN_PLANES, (IN_PLANES, 1000)), u(ks[11], IN_PLANES, (1000,))),
    }


if __name__ == "__main__":
    key = jax.random.PRNGKey(0)
    k_params, k_x, k_x2 = jax.random.split(key, 3)

    N, C_IN, H, W = 2, 4, 4, 4
    params = init_params(k_params, C_IN)
    x = jax.random.normal(k_x, (N, C_IN, H, W), jnp.float32)

    expected = {'oxford102flowers': 102, 'cifar': 100, 'imagenet': 1000}
    for datatype, nc in expected.items():
        out = tri_tunnel_net(x, params, datatype)
        out = jax.block_until_ready(out)
        assert out.shape == (N, nc) and out.dtype == jnp.float32
        ref = tri_tunnel_ref(x, params, datatype)
        assert jnp.allclose(out, ref, rtol=5e-2, atol=5e-2), \
            f"mismatch for {datatype}: max abs err {jnp.max(jnp.abs(out - ref))}"

    # Larger batch exercises multi-tile grid, balanced tiling and row padding.
    N2 = 300
    x2 = jax.random.normal(k_x2, (N2, C_IN, H, W), jnp.float32)
    out2 = jax.block_until_ready(tri_tunnel_net(x2, params, 'cifar'))
    ref2 = tri_tunnel_ref(x2, params, 'cifar')
    assert out2.shape == (N2, 100) and out2.dtype == jnp.float32
    assert jnp.allclose(out2, ref2, rtol=5e-2, atol=5e-2), \
        f"mismatch for large batch: max abs err {jnp.max(jnp.abs(out2 - ref2))}"

    print("KERNEL_OK")
</pallas_src>

<mosaic_0001>
module attributes {stable_mosaic.version = 11 : i64} {
  func.func @tri_tunnel_kernel(%arg0: i32, %arg1: memref<8x4xbf16, #tpu.memory_space<vmem>>, %arg2: memref<4x1024xbf16, #tpu.memory_space<vmem>>, %arg3: memref<1x1024xf32, #tpu.memory_space<vmem>>, %arg4: memref<1024x128xbf16, #tpu.memory_space<vmem>>, %arg5: memref<1x128xf32, #tpu.memory_space<vmem>>, %arg6: memref<8x128xf32, #tpu.memory_space<vmem>>) attributes {dimension_semantics = [#tpu.dimension_semantics<parallel>], iteration_bounds = array<i64: 1>, scalar_prefetch = 0 : i64, scratch_operands = 0 : i64, tpu.core_type = #tpu.core_type<tc>, window_params = [{transform_indices = @transform_0, window_bounds = array<i64: 8, 4>}, {pipeline_mode = #tpu.pipeline_mode<synchronous>, transform_indices = @transform_1, window_bounds = array<i64: 4, 1024>}, {pipeline_mode = #tpu.pipeline_mode<synchronous>, transform_indices = @transform_2, window_bounds = array<i64: 1, 1024>}, {pipeline_mode = #tpu.pipeline_mode<synchronous>, transform_indices = @transform_3, window_bounds = array<i64: 1024, 128>}, {pipeline_mode = #tpu.pipeline_mode<synchronous>, transform_indices = @transform_4, window_bounds = array<i64: 1, 128>}, {transform_indices = @transform_5, window_bounds = array<i64: 8, 128>}]} {
    %c0 = arith.constant 0 : index
    %c0_0 = arith.constant 0 : index
    %0 = vector.load %arg1[%c0, %c0_0] : memref<8x4xbf16, #tpu.memory_space<vmem>>, vector<8x4xbf16>
    %c0_1 = arith.constant 0 : index
    %c0_2 = arith.constant 0 : index
    %1 = vector.load %arg2[%c0_1, %c0_2] : memref<4x1024xbf16, #tpu.memory_space<vmem>>, vector<4x1024xbf16>
    %cst = arith.constant dense<0.000000e+00> : vector<8x1024xf32>
    %2 = tpu.matmul %0, %1, %cst {dimension_numbers = #tpu.dot_dimension_numbers<[1], [0], [0], [1], [0, 0, 1, 1], [], []>} : vector<8x4xbf16>, vector<4x1024xbf16>, vector<8x1024xf32> -> vector<8x1024xf32>
    %c0_3 = arith.constant 0 : index
    %c0_4 = arith.constant 0 : index
    %3 = vector.load %arg3[%c0_3, %c0_4] : memref<1x1024xf32, #tpu.memory_space<vmem>>, vector<1x1024xf32>
    %4 = vector.broadcast %3 : vector<1x1024xf32> to vector<8x1024xf32>
    %5 = arith.addf %2, %4 : vector<8x1024xf32>
    %6 = arith.truncf %5 : vector<8x1024xf32> to vector<8x1024xbf16>
    %c0_5 = arith.constant 0 : index
    %c0_6 = arith.constant 0 : index
    %7 = vector.load %arg4[%c0_5, %c0_6] : memref<1024x128xbf16, #tpu.memory_space<vmem>>, vector<1024x128xbf16>
    %cst_7 = arith.constant dense<0.000000e+00> : vector<8x128xf32>
    %8 = tpu.matmul %6, %7, %cst_7 {dimension_numbers = #tpu.dot_dimension_numbers<[1], [0], [0], [1], [0, 0, 1, 1], [], []>} : vector<8x1024xbf16>, vector<1024x128xbf16>, vector<8x128xf32> -> vector<8x128xf32>
    %c0_8 = arith.constant 0 : index
    %c0_9 = arith.constant 0 : index
    %9 = vector.load %arg5[%c0_8, %c0_9] : memref<1x128xf32, #tpu.memory_space<vmem>>, vector<1x128xf32>
    %10 = vector.broadcast %9 : vector<1x128xf32> to vector<8x128xf32>
    %11 = arith.addf %8, %10 : vector<8x128xf32>
    %c0_10 = arith.constant 0 : index
    %c0_11 = arith.constant 0 : index
    %12 = vector.load %arg6[%c0_10, %c0_11] : memref<8x128xf32, #tpu.memory_space<vmem>>, vector<8x128xf32>
    tpu.vector_store %arg6[%c0_10, %c0_11], %11 {strides = array<i32>} : memref<8x128xf32, #tpu.memory_space<vmem>>, vector<8x128xf32>,
    return
  }
  func.func @transform_0(%arg0: i32) -> (i32, i32) {
    %c0_i32 = arith.constant 0 : i32
    %c0_i32_0 = arith.constant 0 : i32
    return %arg0, %c0_i32 : i32, i32
  }
  func.func @transform_1(%arg0: i32) -> (i32, i32) {
    %c0_i32 = arith.constant 0 : i32
    %c0_i32_0 = arith.constant 0 : i32
    %c0_i32_1 = arith.constant 0 : i32
    return %c0_i32, %c0_i32_0 : i32, i32
  }
  func.func @transform_2(%arg0: i32) -> (i32, i32) {
    %c0_i32 = arith.constant 0 : i32
    %c0_i32_0 = arith.constant 0 : i32
    %c0_i32_1 = arith.constant 0 : i32
    return %c0_i32, %c0_i32_0 : i32, i32
  }
  func.func @transform_3(%arg0: i32) -> (i32, i32) {
    %c0_i32 = arith.constant 0 : i32
    %c0_i32_0 = arith.constant 0 : i32
    %c0_i32_1 = arith.constant 0 : i32
    return %c0_i32, %c0_i32_0 : i32, i32
  }
  func.func @transform_4(%arg0: i32) -> (i32, i32) {
    %c0_i32 = arith.constant 0 : i32
    %c0_i32_0 = arith.constant 0 : i32
    %c0_i32_1 = arith.constant 0 : i32
    return %c0_i32, %c0_i32_0 : i32, i32
  }
  func.func @transform_5(%arg0: i32) -> (i32, i32) {
    %c0_i32 = arith.constant 0 : i32
    %c0_i32_0 = arith.constant 0 : i32
    return %arg0, %c0_i32 : i32, i32
  }
}

module attributes {stable_mosaic.version = 11 : i64} {
  func.func @tri_tunnel_kernel(%arg0: i32, %arg1: memref<8x4xbf16, #tpu.memory_space<vmem>>, %arg2: memref<4x1024xbf16, #tpu.memory_space<vmem>>, %arg3: memref<1x1024xf32, #tpu.memory_space<vmem>>, %arg4: memref<1024x128xbf16, #tpu.memory_space<vmem>>, %arg5: memref<1x128xf32, #tpu.memory_space<vmem>>, %arg6: memref<8x128xf32, #tpu.memory_space<vmem>>) attributes {dimension_semantics = [#tpu.dimension_semantics<parallel>], iteration_bounds = array<i64: 1>, scalar_prefetch = 0 : i64, scratch_operands = 0 : i64, tpu.core_type = #tpu.core_type<tc>, window_params = [{transform_indices = @transform_0, window_bounds = array<i64: 8, 4>}, {pipeline_mode = #tpu.pipeline_mode<synchronous>, transform_indices = @transform_1, window_bounds = array<i64: 4, 1024>}, {pipeline_mode = #tpu.pipeline_mode<synchronous>, transform_indices = @transform_2, window_bounds = array<i64: 1, 1024>}, {pipeline_mode = #tpu.pipeline_mode<synchronous>, transform_indices = @transform_3, window_bounds = array<i64: 1024, 128>}, {pipeline_mode = #tpu.pipeline_mode<synchronous>, transform_indices = @transform_4, window_bounds = array<i64: 1, 128>}, {transform_indices = @transform_5, window_bounds = array<i64: 8, 128>}]} {
    %c0 = arith.constant 0 : index
    %c0_0 = arith.constant 0 : index
    %0 = vector.load %arg1[%c0, %c0_0] : memref<8x4xbf16, #tpu.memory_space<vmem>>, vector<8x4xbf16>
    %c0_1 = arith.constant 0 : index
    %c0_2 = arith.constant 0 : index
    %1 = vector.load %arg2[%c0_1, %c0_2] : memref<4x1024xbf16, #tpu.memory_space<vmem>>, vector<4x1024xbf16>
    %cst = arith.constant dense<0.000000e+00> : vector<8x1024xf32>
    %2 = tpu.matmul %0, %1, %cst {dimension_numbers = #tpu.dot_dimension_numbers<[1], [0], [0], [1], [0, 0, 1, 1], [], []>} : vector<8x4xbf16>, vector<4x1024xbf16>, vector<8x1024xf32> -> vector<8x1024xf32>
    %c0_3 = arith.constant 0 : index
    %c0_4 = arith.constant 0 : index
    %3 = vector.load %arg3[%c0_3, %c0_4] : memref<1x1024xf32, #tpu.memory_space<vmem>>, vector<1x1024xf32>
    %4 = vector.broadcast %3 : vector<1x1024xf32> to vector<8x1024xf32>
    %5 = arith.addf %2, %4 : vector<8x1024xf32>
    %6 = arith.truncf %5 : vector<8x1024xf32> to vector<8x1024xbf16>
    %c0_5 = arith.constant 0 : index
    %c0_6 = arith.constant 0 : index
    %7 = vector.load %arg4[%c0_5, %c0_6] : memref<1024x128xbf16, #tpu.memory_space<vmem>>, vector<1024x128xbf16>
    %cst_7 = arith.constant dense<0.000000e+00> : vector<8x128xf32>
    %8 = tpu.matmul %6, %7, %cst_7 {dimension_numbers = #tpu.dot_dimension_numbers<[1], [0], [0], [1], [0, 0, 1, 1], [], []>} : vector<8x1024xbf16>, vector<1024x128xbf16>, vector<8x128xf32> -> vector<8x128xf32>
    %c0_8 = arith.constant 0 : index
    %c0_9 = arith.constant 0 : index
    %9 = vector.load %arg5[%c0_8, %c0_9] : memref<1x128xf32, #tpu.memory_space<vmem>>, vector<1x128xf32>
    %10 = vector.broadcast %9 : vector<1x128xf32> to vector<8x128xf32>
    %11 = arith.addf %8, %10 : vector<8x128xf32>
    %c0_10 = arith.constant 0 : index
    %c0_11 = arith.constant 0 : index
    %12 = vector.load %arg6[%c0_10, %c0_11] : memref<8x128xf32, #tpu.memory_space<vmem>>, vector<8x128xf32>
    tpu.vector_store %arg6[%c0_10, %c0_11], %11 {strides = array<i32>} : memref<8x128xf32, #tpu.memory_space<vmem>>, vector<8x128xf32>,
    return
  }
  func.func @transform_0(%arg0: i32) -> (i32, i32) {
    %c0_i32 = arith.constant 0 : i32
    %c0_i32_0 = arith.constant 0 : i32
    return %arg0, %c0_i32 : i32, i32
  }
  func.func @transform_1(%arg0: i32) -> (i32, i32) {
    %c0_i32 = arith.constant 0 : i32
    %c0_i32_0 = arith.constant 0 : i32
    %c0_i32_1 = arith.constant 0 : i32
    return %c0_i32, %c0_i32_0 : i32, i32
  }
  func.func @transform_2(%arg0: i32) -> (i32, i32) {
    %c0_i32 = arith.constant 0 : i32
    %c0_i32_0 = arith.constant 0 : i32
    %c0_i32_1 = arith.constant 0 : i32
    return %c0_i32, %c0_i32_0 : i32, i32
  }
  func.func @transform_3(%arg0: i32) -> (i32, i32) {
    %c0_i32 = arith.constant 0 : i32
    %c0_i32_0 = arith.constant 0 : i32
    %c0_i32_1 = arith.constant 0 : i32
    return %c0_i32, %c0_i32_0 : i32, i32
  }
  func.func @transform_4(%arg0: i32) -> (i32, i32) {
    %c0_i32 = arith.constant 0 : i32
    %c0_i32_0 = arith.constant 0 : i32
    %c0_i32_1 = arith.constant 0 : i32
    return %c0_i32, %c0_i32_0 : i32, i32
  }
  func.func @transform_5(%arg0: i32) -> (i32, i32) {
    %c0_i32 = arith.constant 0 : i32
    %c0_i32_0 = arith.constant 0 : i32
    return %arg0, %c0_i32 : i32, i32
  }
}

</mosaic_0001>

<bundles_post_ra>
// kernel: tpu_custom_call.1
= control target key start
LH: loop header
LB: loop body
LE: loop exit
PB: predicated region body
PF: predicated region fallthrough
CT: control target
= control target key end

     0   :  { %10 = vsyncpa [#allocation3], 0  ;;  %s1378_s0 = inlined_call_operand.vmem [shape: bf16[8,4], index: 0, kind: input, shape index: {}]   ;;  %s1379_s1 = inlined_call_operand.hbm [shape: bf16[4,1024], index: 1, kind: input, shape index: {}]   ;;  %s1380_s2 = inlined_call_operand.hbm [shape: f32[1,1024], index: 2, kind: input, shape index: {}]   ;;  %s1381_s3 = inlined_call_operand.hbm [shape: bf16[1024,128], index: 3, kind: input, shape index: {}]   ;;  %s1382_s4 = inlined_call_operand.vmem [shape: f32[1,128], index: 4, kind: input, shape index: {}]   ;;  %s1383_s5 = inlined_call_operand.hbm [shape: f32[8,128], index: 5, kind: output, shape index: {}]  }
   0x1   :  { %11 = vsyncpa [#allocation6], 0  ;;  %s31_s20 = sshll.u32 %s1380_s2, 4  ;;  %s32_s20 = int_to_ptr.hbm [resolvable:$true] %s31_s20 }
   0x2   :  { %12 = vsyncpa [#allocation4], 0  ;;  %s1308_s21 = smov [#allocation5]   ;;  %s20_s25 = sshll.u32 %s1379_s1, 4  ;;  %s21_s25 = int_to_ptr.hbm [resolvable:$true] %s20_s25 }
   0x3   :  { %s33_s22 = sshll.u32 %s1308_s21, 4  ;;  %s1309_s26 = smov [#allocation2]   ;;  %s34_s22 = int_to_ptr.vmem [resolvable:$true] %s33_s22 }
   0x4   :  { %36 = dma.hbm_to_vmem [thread:$0]  %s32_s20, 128, %s34_s22, [#allocation6]  }
   0x5   :  { %s22_s27 = sshll.u32 %s1309_s26, 4  ;;  %s41_s30 = sshll.u32 %s1381_s3, 4  ;;  %s23_s27 = int_to_ptr.vmem [resolvable:$true] %s22_s27  ;;  %s42_s30 = int_to_ptr.hbm [resolvable:$true] %s41_s30 }
   0x6   :  { %25 = dma.hbm_to_vmem [thread:$0]  %s21_s25, 256, %s23_s27, [#allocation3]  }
   0x7   :  { %s1310_s2 = smov [#allocation7]   ;;  %s1311_s7 = smov 64  }
   0x8   :  { %s43_s6 = sshll.u32 %s1310_s2, 4  ;;  %s1312_s8 = smov 4   ;;  %s44_s6 = int_to_ptr.vmem [resolvable:$true] %s43_s6 }
   0x9   :  { %49 = dma.hbm_to_vmem [thread:$0]  %s42_s30, 8192, %s44_s6, [#allocation6], %s1311_s7, %s1311_s7, %s1312_s8  }
   0xa   :  { %1302 = dma.done.wait [#allocation3], 256  }
   0xb   :  { %1303 = vsyncadd [#allocation3], 4294967040 }
   0xc   :  { %1304 = dma.done.wait [#allocation6], 8320  }
   0xd   :  { %1305 = vsyncadd [#allocation6], 4294958976  ;;  %v66_v0 = vld [vmem:[#allocation2] sm:$0xff]  ;;  %v67_v1 = vld [vmem:[#allocation2 + $0x8] sm:$0xff]  ;;  %vm103_vm0 = vcmask 1041408   ;;  %vm99_vm1 = vcmask 31744  }
   0xe   :  { %87 = vst [vmem:[#allocation1] ss:$4 sm:$0xff] %v66_v0  ;;  %v65_v9 = vld [vmem:[%s1378_s0] sm:$0xf]  ;;  %v1142_v16 = vld [vmem:[#allocation7 + $0x38] sm:$0xff]  ;;  %v1141_v23 = vld [vmem:[#allocation7 + $0x30] sm:$0xff] }
   0xf   :  { %90 = vst [vmem:[#allocation1 + $0x20] ss:$4 sm:$0xff] %v67_v1  ;;  %v1150_v17 = vld [vmem:[#allocation7 + $0x78] sm:$0xff]  ;;  %v1149_v24 = vld [vmem:[#allocation7 + $0x70] sm:$0xff]  ;;  %v1140_v27 = vld [vmem:[#allocation7 + $0x28] sm:$0xff]  ;;  %s1313_s10 = smov [#allocation8]  }
  0x10   :  { %v1158_v20 = vld [vmem:[#allocation7 + $0xb8] sm:$0xff]  ;;  %v1157_v25 = vld [vmem:[#allocation7 + $0xb0] sm:$0xff]  ;;  %v1148_v28 = vld [vmem:[#allocation7 + $0x68] sm:$0xff]  ;;  %s858_s11 = sshll.u32 %s1313_s10, 4  ;;  %s860_s13 = sshll.u32 %s1383_s5, 4  ;;  %s859_s11 = int_to_ptr.vmem [resolvable:$true] %s858_s11  ;;  %s861_s13 = int_to_ptr.hbm [resolvable:$true] %s860_s13 }
  0x11   :  { %v1166_v21 = vld [vmem:[#allocation7 + $0xf8] sm:$0xff]  ;;  %v1165_v26 = vld [vmem:[#allocation7 + $0xf0] sm:$0xff]  ;;  %v1156_v29 = vld [vmem:[#allocation7 + $0xa8] sm:$0xff] }
  0x12   :  { %v1164_v30 = vld [vmem:[#allocation7 + $0xe8] sm:$0xff]  ;;  %v1139_v31 = vld [vmem:[#allocation7 + $0x20] sm:$0xff]  ;;  %v1138_v35 = vld [vmem:[#allocation7 + $0x18] sm:$0xff] }
  0x13   :  { %v1155_v32 = vld [vmem:[#allocation7 + $0xa0] sm:$0xff]  ;;  %v1154_v36 = vld [vmem:[#allocation7 + $0x98] sm:$0xff]  ;;  %v1137_v39 = vld [vmem:[#allocation7 + $0x10] sm:$0xff] }
  0x14   :  { %v1147_v33 = vld [vmem:[#allocation7 + $0x60] sm:$0xff]  ;;  %v1146_v37 = vld [vmem:[#allocation7 + $0x58] sm:$0xff]  ;;  %v1153_v40 = vld [vmem:[#allocation7 + $0x90] sm:$0xff] }
  0x15   :  { %v91_v2 = vld.sshfl [vmem:[#allocation1] sm:$0xff pattern:$0x73625140]  ;;  %v93_v3 = vld.sshfl [vmem:[#allocation1 + $0x10] sm:$0xff pattern:$0x73625140] }
  0x16   :  { %v104_v4 = vsel %vm103_vm0, %v91_v2, 0  ;;  %v108_v5 = vsel %vm103_vm0, %v93_v3, 0  ;;  %v94_v6 = vld.sshfl [vmem:[#allocation1 + $0x18] sm:$0xff pattern:$0x73625140]  ;;  %v1163_v34 = vld [vmem:[#allocation7 + $0xe0] sm:$0xff] }
  0x17   :  { %127 = vmatpush.bf16.msra.mxu0 %v104_v4  ;;  %153 = vmatpush.bf16.msra.mxu2 %v108_v5  ;;  %v110_v7 = vsel %vm103_vm0, %v94_v6, 0  ;;  %v92_v8 = vld.sshfl [vmem:[#allocation1 + $0x8] sm:$0xff pattern:$0x73625140]  ;;  %v1162_v38 = vld [vmem:[#allocation7 + $0xd8] sm:$0xff]  ;;  %v1145_v41 = vld [vmem:[#allocation7 + $0x50] sm:$0xff] }
  0x18   :  { %166 = vmatpush.bf16.msra.mxu3 %v110_v7  ;;  %v106_v10 = vsel %vm103_vm0, %v92_v8, 0  ;;  %v97_v11 = vld.sshfl [vmem:[#allocation1 + $0x30] sm:$0xff pattern:$0x73625140]  ;;  %v1136_v43 = vld [vmem:[#allocation7 + $0x8] sm:$0xff]  ;;  %v1135_v47 = vld [vmem:[#allocation7] sm:$0xff] }
  0x19   :  { %140 = vmatpush.bf16.msra.mxu1 %v106_v10  ;;  %v116_v12 = vsel %vm103_vm0, %v97_v11, 0  ;;  %v98_v13 = vld.sshfl [vmem:[#allocation1 + $0x38] sm:$0xff pattern:$0x73625140]  ;;  %v1161_v42 = vld [vmem:[#allocation7 + $0xd0] sm:$0xff]  ;;  %v1152_v44 = vld [vmem:[#allocation7 + $0x88] sm:$0xff] }
  0x1a   :  { %871 = vmatmul.msk.bf16.vlgmr.msra.gmra.mxu0 %vm99_vm1, %v65_v9  ;;  %873 = vmatmul.msk.bf16.vlgmr.msra.gmra.mxu2 %vm99_vm1, %v65_v9  ;;  %v118_v14 = vsel %vm103_vm0, %v98_v13, 0  ;;  %v95_v15 = vld.sshfl [vmem:[#allocation1 + $0x20] sm:$0xff pattern:$0x73625140]  ;;  %v1144_v45 = vld [vmem:[#allocation7 + $0x48] sm:$0xff]  ;;  %v1174_v48 = vld [vmem:[#allocation7 + $0x138] sm:$0xff] }
  0x1b   :  { %874 = vmatmul.msk.bf16.vlgmr.msra.gmra.mxu3 %vm99_vm1, %v65_v9  ;;  %205 = vmatpush.bf16.msrb.mxu2 %v116_v12  ;;  %v112_v18 = vsel %vm103_vm0, %v95_v15, 0  ;;  %v96_v19 = vld.sshfl [vmem:[#allocation1 + $0x28] sm:$0xff pattern:$0x73625140]  ;;  %v1151_v49 = vld [vmem:[#allocation7 + $0x80] sm:$0xff]  ;;  %v1182_v52 = vld [vmem:[#allocation7 + $0x178] sm:$0xff] }
  0x1c   :  { %218 = vmatpush.bf16.msrb.mxu3 %v118_v14  ;;  %872 = vmatmul.msk.bf16.vlgmr.msra.gmra.mxu1 %vm99_vm1, %v65_v9  ;;  %v114_v22 = vsel %vm103_vm0, %v96_v19, 0  ;;  %v1160_v46 = vld [vmem:[#allocation7 + $0xc8] sm:$0xff]  ;;  %v1143_v50 = vld [vmem:[#allocation7 + $0x40] sm:$0xff]  ;;  %v1190_v53 = vld [vmem:[#allocation7 + $0x1b8] sm:$0xff] }
  0x1d   :  { %179 = vmatpush.bf16.msrb.mxu0 %v112_v18  ;;  %192 = vmatpush.bf16.msrb.mxu1 %v114_v22  ;;  %v1159_v51 = vld [vmem:[#allocation7 + $0xc0] sm:$0xff]  ;;  %v1198_v54 = vld [vmem:[#allocation7 + $0x1f8] sm:$0xff]  ;;  %v1173_v55 = vld [vmem:[#allocation7 + $0x130] sm:$0xff] }
  0x1e   :  { %v1181_v56 = vld [vmem:[#allocation7 + $0x170] sm:$0xff]  ;;  %v1172_v57 = vld [vmem:[#allocation7 + $0x128] sm:$0xff]  ;;  %v1171_v61 = vld [vmem:[#allocation7 + $0x120] sm:$0xff] }
  0x1f   :  { %774 = vmatpush.bf16.msra.mxu2 %v1158_v20  ;;  %v1180_v58 = vld [vmem:[#allocation7 + $0x168] sm:$0xff]  ;;  %v1189_v59 = vld [vmem:[#allocation7 + $0x1b0] sm:$0xff]  ;;  %v1179_v62 = vld [vmem:[#allocation7 + $0x160] sm:$0xff] }
  0x20   :  { %787 = vmatpush.bf16.msra.mxu3 %v1166_v21  ;;  %v1197_v60 = vld [vmem:[#allocation7 + $0x1f0] sm:$0xff]  ;;  %v1188_v63 = vld [vmem:[#allocation7 + $0x1a8] sm:$0xff]  ;;  %v1170_v1 = vld [vmem:[#allocation7 + $0x118] sm:$0xff] }
  0x21   :  { %748 = vmatpush.bf16.msra.mxu0 %v1142_v16  ;;  %761 = vmatpush.bf16.msra.mxu1 %v1150_v17  ;;  %v1196_v0 = vld [vmem:[#allocation7 + $0x1e8] sm:$0xff]  ;;  %v1178_v2 = vld [vmem:[#allocation7 + $0x158] sm:$0xff]  ;;  %v1187_v3 = vld [vmem:[#allocation7 + $0x1a0] sm:$0xff] }
  0x22   :  { %v1195_v4 = vld [vmem:[#allocation7 + $0x1e0] sm:$0xff]  ;;  %v1169_v5 = vld [vmem:[#allocation7 + $0x110] sm:$0xff]  ;;  %v1186_v7 = vld [vmem:[#allocation7 + $0x198] sm:$0xff] }
  0x23   :  { %775 = vmatpush.bf16.msra.mxu2 %v1157_v25  ;;  %v1177_v6 = vld [vmem:[#allocation7 + $0x150] sm:$0xff]  ;;  %v1194_v8 = vld [vmem:[#allocation7 + $0x1d8] sm:$0xff]  ;;  %v1176_v10 = vld [vmem:[#allocation7 + $0x148] sm:$0xff] }
  0x24   :  { %788 = vmatpush.bf16.msra.mxu3 %v1165_v26  ;;  %v1185_v11 = vld [vmem:[#allocation7 + $0x190] sm:$0xff]  ;;  %v1167_v13 = vld [vmem:[#allocation7 + $0x100] sm:$0xff]  ;;  %v1184_v15 = vld [vmem:[#allocation7 + $0x188] sm:$0xff] }
  0x25   :  { %749 = vmatpush.bf16.msra.mxu0 %v1141_v23  ;;  %762 = vmatpush.bf16.msra.mxu1 %v1149_v24  ;;  %v1193_v12 = vld [vmem:[#allocation7 + $0x1d0] sm:$0xff]  ;;  %v1175_v14 = vld [vmem:[#allocation7 + $0x140] sm:$0xff]  ;;  %v1192_v16 = vld [vmem:[#allocation7 + $0x1c8] sm:$0xff] }
  0x26   :  { %v1183_v17 = vld [vmem:[#allocation7 + $0x180] sm:$0xff]  ;;  %v68_v19 = vld [vmem:[#allocation5] sm:$0xff] }
  0x27   :  { %776 = vmatpush.bf16.msra.mxu2 %v1156_v29  ;;  %v1191_v18 = vld [vmem:[#allocation7 + $0x1c0] sm:$0xff]  ;;  %v70_v20 = vperm.slane %v68_v19, 0  ;;  %v71_v21 = vperm.slane %v68_v19, 1 }
  0x28   :  { %789 = vmatpush.bf16.msra.mxu3 %v1164_v30 }
  0x29   :  { %750 = vmatpush.bf16.msra.mxu0 %v1140_v27  ;;  %763 = vmatpush.bf16.msra.mxu1 %v1148_v28  ;;  %v72_v27 = vperm.slane %v68_v19, 2  ;;  %v73_v28 = vperm.slane %v68_v19, 3 }
  0x2a   :  { %875 = vmatmul.msk.bf16.vlgmr.msrb.gmra.mxu0 %vm99_vm1, %v65_v9  ;;  %877 = vmatmul.msk.bf16.vlgmr.msrb.gmra.mxu2 %vm99_vm1, %v65_v9 }
  0x2b   :  { %878 = vmatmul.msk.bf16.vlgmr.msrb.gmra.mxu3 %vm99_vm1, %v65_v9  ;;  %777 = vmatpush.bf16.msra.mxu2 %v1155_v32 }
  0x2c   :  { %876 = vmatmul.msk.bf16.vlgmr.msrb.gmra.mxu1 %vm99_vm1, %v65_v9  ;;  %790 = vmatpush.bf16.msra.mxu3 %v1163_v34  ;;  %v1168_v9 = vld [vmem:[#allocation7 + $0x108] sm:$0xff] }
  0x2d   :  { %751 = vmatpush.bf16.msra.mxu0 %v1139_v31  ;;  %764 = vmatpush.bf16.msra.mxu1 %v1147_v33 }
  0x2f   :  { %778 = vmatpush.bf16.msra.mxu2 %v1154_v36 }
  0x30   :  { %791 = vmatpush.bf16.msra.mxu3 %v1162_v38  ;;  %v74_v38 = vperm.slane %v68_v19, 4 }
  0x31   :  { %752 = vmatpush.bf16.msra.mxu0 %v1138_v35  ;;  %765 = vmatpush.bf16.msra.mxu1 %v1146_v37 }
  0x33   :  { %779 = vmatpush.bf16.msra.mxu2 %v1153_v40 }
  0x34   :  { %792 = vmatpush.bf16.msra.mxu3 %v1161_v42 }
  0x35   :  { %753 = vmatpush.bf16.msra.mxu0 %v1137_v39  ;;  %766 = vmatpush.bf16.msra.mxu1 %v1145_v41  ;;  %v75_v41 = vperm.slane %v68_v19, 5 }
  0x37   :  { %780 = vmatpush.bf16.msra.mxu2 %v1152_v44 }
  0x38   :  { %793 = vmatpush.bf16.msra.mxu3 %v1160_v46 }
  0x39   :  { %754 = vmatpush.bf16.msra.mxu0 %v1136_v43  ;;  %767 = vmatpush.bf16.msra.mxu1 %v1144_v45 }
  0x3b   :  { %781 = vmatpush.bf16.msra.mxu2 %v1151_v49 }
  0x3c   :  { %794 = vmatpush.bf16.msra.mxu3 %v1159_v51 }
  0x3d   :  { %755 = vmatpush.bf16.msra.mxu0 %v1135_v47  ;;  %768 = vmatpush.bf16.msra.mxu1 %v1143_v50  ;;  %v76_v47 = vperm.slane %v68_v19, 6 }
  0x3f   :  { %826 = vmatpush.bf16.msrb.mxu2 %v1190_v53 }
  0x40   :  { %839 = vmatpush.bf16.msrb.mxu3 %v1198_v54 }
  0x41   :  { %800 = vmatpush.bf16.msrb.mxu0 %v1174_v48  ;;  %813 = vmatpush.bf16.msrb.mxu1 %v1182_v52  ;;  %v77_v48 = vperm.slane %v68_v19, 7 }
  0x43   :  { %827 = vmatpush.bf16.msrb.mxu2 %v1189_v59 }
  0x44   :  { %840 = vmatpush.bf16.msrb.mxu3 %v1197_v60 }
  0x45   :  { %801 = vmatpush.bf16.msrb.mxu0 %v1173_v55  ;;  %814 = vmatpush.bf16.msrb.mxu1 %v1181_v56 }
  0x47   :  { %828 = vmatpush.bf16.msrb.mxu2 %v1188_v63 }
  0x48   :  { %841 = vmatpush.bf16.msrb.mxu3 %v1196_v0 }
  0x49   :  { %802 = vmatpush.bf16.msrb.mxu0 %v1172_v57  ;;  %815 = vmatpush.bf16.msrb.mxu1 %v1180_v58 }
  0x4b   :  { %829 = vmatpush.bf16.msrb.mxu2 %v1187_v3 }
  0x4c   :  { %842 = vmatpush.bf16.msrb.mxu3 %v1195_v4 }
  0x4d   :  { %803 = vmatpush.bf16.msrb.mxu0 %v1171_v61  ;;  %816 = vmatpush.bf16.msrb.mxu1 %v1179_v62  ;;  %v1205_v62 = vld [vmem:[%s1382_s4] ss:$0 sm:$0xff] }
  0x4f   :  { %830 = vmatpush.bf16.msrb.mxu2 %v1186_v7 }
  0x50   :  { %843 = vmatpush.bf16.msrb.mxu3 %v1194_v8 }
  0x51   :  { %804 = vmatpush.bf16.msrb.mxu0 %v1170_v1  ;;  %817 = vmatpush.bf16.msrb.mxu1 %v1178_v2 }
  0x53   :  { %831 = vmatpush.bf16.msrb.mxu2 %v1185_v11 }
  0x54   :  { %844 = vmatpush.bf16.msrb.mxu3 %v1193_v12 }
  0x55   :  { %805 = vmatpush.bf16.msrb.mxu0 %v1169_v5  ;;  %818 = vmatpush.bf16.msrb.mxu1 %v1177_v6 }
  0x57   :  { %832 = vmatpush.bf16.msrb.mxu2 %v1184_v15 }
  0x58   :  { %845 = vmatpush.bf16.msrb.mxu3 %v1192_v16 }
  0x59   :  { %806 = vmatpush.bf16.msrb.mxu0 %v1168_v9  ;;  %819 = vmatpush.bf16.msrb.mxu1 %v1176_v10 }
  0x5b   :  { %833 = vmatpush.bf16.msrb.mxu2 %v1183_v17 }
  0x5c   :  { %846 = vmatpush.bf16.msrb.mxu3 %v1191_v18 }
  0x5d   :  { %807 = vmatpush.bf16.msrb.mxu0 %v1167_v13  ;;  %820 = vmatpush.bf16.msrb.mxu1 %v1175_v14 }
  0x97   :  { %v129_v22 = vpop.f32.mrf.mxu0 }
  0x98   :  { %v130_v23 = vadd.f32 %v129_v22, %v70_v20 }
  0x99   :  { %v142_v24 = vpop.f32.mrf.mxu1 }
  0x9a   :  { %v224_v25 = vpack.c.bf16 %v130_v23, %v130_v23  ;;  %v143_v26 = vadd.f32 %v142_v24, %v71_v21 }
  0x9c   :  { %v225_v29 = vpack.c.bf16 %v143_v26, %v143_v26  ;;  %756 = vmatmul.bf16.vlgmr.msra.gmra.mxu0 %v224_v25 }
  0x9d   :  { %v155_v30 = vpop.f32.mrf.mxu2 }
  0x9e   :  { %v156_v31 = vadd.f32 %v155_v30, %v72_v27  ;;  %v168_v32 = vpop.f32.mrf.mxu3  ;;  %769 = vmatmul.bf16.vlgmr.msra.gmra.mxu1 %v225_v29 }
  0x9f   :  { %v169_v33 = vadd.f32 %v168_v32, %v73_v28  ;;  %v131_v34 = vpop.f32.mrf.mxu0 }
  0xa0   :  { %v226_v35 = vpack.c.bf16 %v156_v31, %v156_v31 }
  0xa1   :  { %v227_v36 = vpack.c.bf16 %v169_v33, %v169_v33  ;;  %v144_v37 = vpop.f32.mrf.mxu1 }
  0xa2   :  { %782 = vmatmul.bf16.vlgmr.msra.gmra.mxu2 %v226_v35 }
  0xa3   :  { %795 = vmatmul.bf16.vlgmr.msra.gmra.mxu3 %v227_v36 }
  0xa5   :  { %v157_v39 = vpop.f32.mrf.mxu2 }
  0xa6   :  { %v170_v40 = vpop.f32.mrf.mxu3 }
  0xa7   :  { %v181_v42 = vpop.f32.mrf.mxu0 }
  0xa8   :  { %v182_v43 = vadd.f32 %v181_v42, %v74_v38 }
  0xa9   :  { %v194_v44 = vpop.f32.mrf.mxu1 }
  0xaa   :  { %v228_v45 = vpack.c.bf16 %v182_v43, %v182_v43  ;;  %v195_v46 = vadd.f32 %v194_v44, %v75_v41 }
  0xac   :  { %v229_v49 = vpack.c.bf16 %v195_v46, %v195_v46  ;;  %808 = vmatmul.bf16.vlgmr.msrb.gmra.mxu0 %v228_v45 }
  0xad   :  { %v207_v50 = vpop.f32.mrf.mxu2 }
  0xae   :  { %v208_v51 = vadd.f32 %v207_v50, %v76_v47  ;;  %v220_v52 = vpop.f32.mrf.mxu3  ;;  %821 = vmatmul.bf16.vlgmr.msrb.gmra.mxu1 %v229_v49 }
  0xaf   :  { %v221_v53 = vadd.f32 %v220_v52, %v77_v48  ;;  %v183_v54 = vpop.f32.mrf.mxu0 }
  0xb0   :  { %v230_v55 = vpack.c.bf16 %v208_v51, %v208_v51 }
  0xb1   :  { %v231_v56 = vpack.c.bf16 %v221_v53, %v221_v53  ;;  %v196_v57 = vpop.f32.mrf.mxu1 }
  0xb2   :  { %834 = vmatmul.bf16.vlgmr.msrb.gmra.mxu2 %v230_v55 }
  0xb3   :  { %847 = vmatmul.bf16.vlgmr.msrb.gmra.mxu3 %v231_v56 }
  0xb5   :  { %v209_v58 = vpop.f32.mrf.mxu2 }
  0xb6   :  { %v222_v59 = vpop.f32.mrf.mxu3 }
 0x119   :  { %v757_v60 = vpop.f32.mrf.mxu0 }
 0x11a   :  { %v758_v63 = vadd.f32 %v1205_v62, %v757_v60 }
 0x11b   :  { %v770_v61 = vpop.f32.mrf.mxu1 }
 0x11c   :  { %v771_v2 = vadd.f32 %v770_v61, %v758_v63 }
 0x121   :  { %v759_v0 = vpop.f32.mrf.mxu0 }
 0x123   :  { %v772_v1 = vpop.f32.mrf.mxu1 }
 0x125   :  { %v783_v3 = vpop.f32.mrf.mxu2 }
 0x126   :  { %v796_v4 = vpop.f32.mrf.mxu3  ;;  %v784_v5 = vadd.f32 %v783_v3, %v771_v2 }
 0x128   :  { %v797_v8 = vadd.f32 %v796_v4, %v784_v5 }
 0x129   :  { %v809_v6 = vpop.f32.mrf.mxu0 }
 0x12a   :  { %v810_v11 = vadd.f32 %v809_v6, %v797_v8 }
 0x12b   :  { %v822_v7 = vpop.f32.mrf.mxu1 }
 0x12c   :  { %v823_v14 = vadd.f32 %v822_v7, %v810_v11 }
 0x12d   :  { %v785_v9 = vpop.f32.mrf.mxu2 }
 0x12e   :  { %v798_v10 = vpop.f32.mrf.mxu3 }
 0x131   :  { %v811_v12 = vpop.f32.mrf.mxu0 }
 0x133   :  { %v824_v13 = vpop.f32.mrf.mxu1 }
 0x135   :  { %v835_v15 = vpop.f32.mrf.mxu2 }
 0x136   :  { %v836_v16 = vadd.f32 %v835_v15, %v823_v14  ;;  %v848_v17 = vpop.f32.mrf.mxu3 }
 0x138   :  { %v849_v18 = vadd.f32 %v848_v17, %v836_v16 }
 0x13a   :  { %852 = vst [vmem:[#allocation8] sm:$0xff] %v849_v18 }
 0x13b   :  { %863 = dma.vmem_to_hbm [thread:$0]  %s859_s11, 128, %s861_s13, [#allocation4]  }
 0x13d   :  { %v837_v19 = vpop.f32.mrf.mxu2 }
 0x13e   :  { %v850_v20 = vpop.f32.mrf.mxu3 }
 0x13f   :  { %1306 = dma.done.wait [#allocation4], 128  }
 0x140   :  { %1307 = vsyncadd [#allocation4], 4294967168 }
 0x141   :  { %868 = vsyncpa [#allocation3], 1 }
 0x142   :  { %869 = vsyncpa [#allocation6], 1 }
 0x143   :  { %870 = vsyncpa [#allocation4], 1 }

// kernel: tpu_custom_call.1
= control target key start
LH: loop header
LB: loop body
LE: loop exit
PB: predicated region body
PF: predicated region fallthrough
CT: control target
= control target key end

     0   :  { %10 = vsyncpa [#allocation3], 0  ;;  %s1378_s0 = inlined_call_operand.vmem [shape: bf16[8,4], index: 0, kind: input, shape index: {}]   ;;  %s1379_s1 = inlined_call_operand.hbm [shape: bf16[4,1024], index: 1, kind: input, shape index: {}]   ;;  %s1380_s2 = inlined_call_operand.hbm [shape: f32[1,1024], index: 2, kind: input, shape index: {}]   ;;  %s1381_s3 = inlined_call_operand.hbm [shape: bf16[1024,128], index: 3, kind: input, shape index: {}]   ;;  %s1382_s4 = inlined_call_operand.vmem [shape: f32[1,128], index: 4, kind: input, shape index: {}]   ;;  %s1383_s5 = inlined_call_operand.hbm [shape: f32[8,128], index: 5, kind: output, shape index: {}]  }
   0x1   :  { %11 = vsyncpa [#allocation6], 0  ;;  %s31_s20 = sshll.u32 %s1380_s2, 4  ;;  %s32_s20 = int_to_ptr.hbm [resolvable:$true] %s31_s20 }
   0x2   :  { %12 = vsyncpa [#allocation4], 0  ;;  %s1308_s21 = smov [#allocation5]   ;;  %s20_s25 = sshll.u32 %s1379_s1, 4  ;;  %s21_s25 = int_to_ptr.hbm [resolvable:$true] %s20_s25 }
   0x3   :  { %s33_s22 = sshll.u32 %s1308_s21, 4  ;;  %s1309_s26 = smov [#allocation2]   ;;  %s34_s22 = int_to_ptr.vmem [resolvable:$true] %s33_s22 }
   0x4   :  { %36 = dma.hbm_to_vmem [thread:$0]  %s32_s20, 128, %s34_s22, [#allocation6]  }
   0x5   :  { %s22_s27 = sshll.u32 %s1309_s26, 4  ;;  %s41_s30 = sshll.u32 %s1381_s3, 4  ;;  %s23_s27 = int_to_ptr.vmem [resolvable:$true] %s22_s27  ;;  %s42_s30 = int_to_ptr.hbm [resolvable:$true] %s41_s30 }
   0x6   :  { %25 = dma.hbm_to_vmem [thread:$0]  %s21_s25, 256, %s23_s27, [#allocation3]  }
   0x7   :  { %s1310_s2 = smov [#allocation7]   ;;  %s1311_s7 = smov 64  }
   0x8   :  { %s43_s6 = sshll.u32 %s1310_s2, 4  ;;  %s1312_s8 = smov 4   ;;  %s44_s6 = int_to_ptr.vmem [resolvable:$true] %s43_s6 }
   0x9   :  { %49 = dma.hbm_to_vmem [thread:$0]  %s42_s30, 8192, %s44_s6, [#allocation6], %s1311_s7, %s1311_s7, %s1312_s8  }
   0xa   :  { %1302 = dma.done.wait [#allocation3], 256  }
   0xb   :  { %1303 = vsyncadd [#allocation3], 4294967040 }
   0xc   :  { %1304 = dma.done.wait [#allocation6], 8320  }
   0xd   :  { %1305 = vsyncadd [#allocation6], 4294958976  ;;  %v66_v0 = vld [vmem:[#allocation2] sm:$0xff]  ;;  %v67_v1 = vld [vmem:[#allocation2 + $0x8] sm:$0xff]  ;;  %vm103_vm0 = vcmask 1041408   ;;  %vm99_vm1 = vcmask 31744  }
   0xe   :  { %87 = vst [vmem:[#allocation1] ss:$4 sm:$0xff] %v66_v0  ;;  %v65_v9 = vld [vmem:[%s1378_s0] sm:$0xf]  ;;  %v1142_v16 = vld [vmem:[#allocation7 + $0x38] sm:$0xff]  ;;  %v1141_v23 = vld [vmem:[#allocation7 + $0x30] sm:$0xff] }
   0xf   :  { %90 = vst [vmem:[#allocation1 + $0x20] ss:$4 sm:$0xff] %v67_v1  ;;  %v1150_v17 = vld [vmem:[#allocation7 + $0x78] sm:$0xff]  ;;  %v1149_v24 = vld [vmem:[#allocation7 + $0x70] sm:$0xff]  ;;  %v1140_v27 = vld [vmem:[#allocation7 + $0x28] sm:$0xff]  ;;  %s1313_s10 = smov [#allocation8]  }
  0x10   :  { %v1158_v20 = vld [vmem:[#allocation7 + $0xb8] sm:$0xff]  ;;  %v1157_v25 = vld [vmem:[#allocation7 + $0xb0] sm:$0xff]  ;;  %v1148_v28 = vld [vmem:[#allocation7 + $0x68] sm:$0xff]  ;;  %s858_s11 = sshll.u32 %s1313_s10, 4  ;;  %s860_s13 = sshll.u32 %s1383_s5, 4  ;;  %s859_s11 = int_to_ptr.vmem [resolvable:$true] %s858_s11  ;;  %s861_s13 = int_to_ptr.hbm [resolvable:$true] %s860_s13 }
  0x11   :  { %v1166_v21 = vld [vmem:[#allocation7 + $0xf8] sm:$0xff]  ;;  %v1165_v26 = vld [vmem:[#allocation7 + $0xf0] sm:$0xff]  ;;  %v1156_v29 = vld [vmem:[#allocation7 + $0xa8] sm:$0xff] }
  0x12   :  { %v1164_v30 = vld [vmem:[#allocation7 + $0xe8] sm:$0xff]  ;;  %v1139_v31 = vld [vmem:[#allocation7 + $0x20] sm:$0xff]  ;;  %v1138_v35 = vld [vmem:[#allocation7 + $0x18] sm:$0xff] }
  0x13   :  { %v1155_v32 = vld [vmem:[#allocation7 + $0xa0] sm:$0xff]  ;;  %v1154_v36 = vld [vmem:[#allocation7 + $0x98] sm:$0xff]  ;;  %v1137_v39 = vld [vmem:[#allocation7 + $0x10] sm:$0xff] }
  0x14   :  { %v1147_v33 = vld [vmem:[#allocation7 + $0x60] sm:$0xff]  ;;  %v1146_v37 = vld [vmem:[#allocation7 + $0x58] sm:$0xff]  ;;  %v1153_v40 = vld [vmem:[#allocation7 + $0x90] sm:$0xff] }
  0x15   :  { %v91_v2 = vld.sshfl [vmem:[#allocation1] sm:$0xff pattern:$0x73625140]  ;;  %v93_v3 = vld.sshfl [vmem:[#allocation1 + $0x10] sm:$0xff pattern:$0x73625140] }
  0x16   :  { %v104_v4 = vsel %vm103_vm0, %v91_v2, 0  ;;  %v108_v5 = vsel %vm103_vm0, %v93_v3, 0  ;;  %v94_v6 = vld.sshfl [vmem:[#allocation1 + $0x18] sm:$0xff pattern:$0x73625140]  ;;  %v1163_v34 = vld [vmem:[#allocation7 + $0xe0] sm:$0xff] }
  0x17   :  { %127 = vmatpush.bf16.msra.mxu0 %v104_v4  ;;  %153 = vmatpush.bf16.msra.mxu2 %v108_v5  ;;  %v110_v7 = vsel %vm103_vm0, %v94_v6, 0  ;;  %v92_v8 = vld.sshfl [vmem:[#allocation1 + $0x8] sm:$0xff pattern:$0x73625140]  ;;  %v1162_v38 = vld [vmem:[#allocation7 + $0xd8] sm:$0xff]  ;;  %v1145_v41 = vld [vmem:[#allocation7 + $0x50] sm:$0xff] }
  0x18   :  { %166 = vmatpush.bf16.msra.mxu3 %v110_v7  ;;  %v106_v10 = vsel %vm103_vm0, %v92_v8, 0  ;;  %v97_v11 = vld.sshfl [vmem:[#allocation1 + $0x30] sm:$0xff pattern:$0x73625140]  ;;  %v1136_v43 = vld [vmem:[#allocation7 + $0x8] sm:$0xff]  ;;  %v1135_v47 = vld [vmem:[#allocation7] sm:$0xff] }
  0x19   :  { %140 = vmatpush.bf16.msra.mxu1 %v106_v10  ;;  %v116_v12 = vsel %vm103_vm0, %v97_v11, 0  ;;  %v98_v13 = vld.sshfl [vmem:[#allocation1 + $0x38] sm:$0xff pattern:$0x73625140]  ;;  %v1161_v42 = vld [vmem:[#allocation7 + $0xd0] sm:$0xff]  ;;  %v1152_v44 = vld [vmem:[#allocation7 + $0x88] sm:$0xff] }
  0x1a   :  { %871 = vmatmul.msk.bf16.vlgmr.msra.gmra.mxu0 %vm99_vm1, %v65_v9  ;;  %873 = vmatmul.msk.bf16.vlgmr.msra.gmra.mxu2 %vm99_vm1, %v65_v9  ;;  %v118_v14 = vsel %vm103_vm0, %v98_v13, 0  ;;  %v95_v15 = vld.sshfl [vmem:[#allocation1 + $0x20] sm:$0xff pattern:$0x73625140]  ;;  %v1144_v45 = vld [vmem:[#allocation7 + $0x48] sm:$0xff]  ;;  %v1174_v48 = vld [vmem:[#allocation7 + $0x138] sm:$0xff] }
  0x1b   :  { %874 = vmatmul.msk.bf16.vlgmr.msra.gmra.mxu3 %vm99_vm1, %v65_v9  ;;  %205 = vmatpush.bf16.msrb.mxu2 %v116_v12  ;;  %v112_v18 = vsel %vm103_vm0, %v95_v15, 0  ;;  %v96_v19 = vld.sshfl [vmem:[#allocation1 + $0x28] sm:$0xff pattern:$0x73625140]  ;;  %v1151_v49 = vld [vmem:[#allocation7 + $0x80] sm:$0xff]  ;;  %v1182_v52 = vld [vmem:[#allocation7 + $0x178] sm:$0xff] }
  0x1c   :  { %218 = vmatpush.bf16.msrb.mxu3 %v118_v14  ;;  %872 = vmatmul.msk.bf16.vlgmr.msra.gmra.mxu1 %vm99_vm1, %v65_v9  ;;  %v114_v22 = vsel %vm103_vm0, %v96_v19, 0  ;;  %v1160_v46 = vld [vmem:[#allocation7 + $0xc8] sm:$0xff]  ;;  %v1143_v50 = vld [vmem:[#allocation7 + $0x40] sm:$0xff]  ;;  %v1190_v53 = vld [vmem:[#allocation7 + $0x1b8] sm:$0xff] }
  0x1d   :  { %179 = vmatpush.bf16.msrb.mxu0 %v112_v18  ;;  %192 = vmatpush.bf16.msrb.mxu1 %v114_v22  ;;  %v1159_v51 = vld [vmem:[#allocation7 + $0xc0] sm:$0xff]  ;;  %v1198_v54 = vld [vmem:[#allocation7 + $0x1f8] sm:$0xff]  ;;  %v1173_v55 = vld [vmem:[#allocation7 + $0x130] sm:$0xff] }
  0x1e   :  { %v1181_v56 = vld [vmem:[#allocation7 + $0x170] sm:$0xff]  ;;  %v1172_v57 = vld [vmem:[#allocation7 + $0x128] sm:$0xff]  ;;  %v1171_v61 = vld [vmem:[#allocation7 + $0x120] sm:$0xff] }
  0x1f   :  { %774 = vmatpush.bf16.msra.mxu2 %v1158_v20  ;;  %v1180_v58 = vld [vmem:[#allocation7 + $0x168] sm:$0xff]  ;;  %v1189_v59 = vld [vmem:[#allocation7 + $0x1b0] sm:$0xff]  ;;  %v1179_v62 = vld [vmem:[#allocation7 + $0x160] sm:$0xff] }
  0x20   :  { %787 = vmatpush.bf16.msra.mxu3 %v1166_v21  ;;  %v1197_v60 = vld [vmem:[#allocation7 + $0x1f0] sm:$0xff]  ;;  %v1188_v63 = vld [vmem:[#allocation7 + $0x1a8] sm:$0xff]  ;;  %v1170_v1 = vld [vmem:[#allocation7 + $0x118] sm:$0xff] }
  0x21   :  { %748 = vmatpush.bf16.msra.mxu0 %v1142_v16  ;;  %761 = vmatpush.bf16.msra.mxu1 %v1150_v17  ;;  %v1196_v0 = vld [vmem:[#allocation7 + $0x1e8] sm:$0xff]  ;;  %v1178_v2 = vld [vmem:[#allocation7 + $0x158] sm:$0xff]  ;;  %v1187_v3 = vld [vmem:[#allocation7 + $0x1a0] sm:$0xff] }
  0x22   :  { %v1195_v4 = vld [vmem:[#allocation7 + $0x1e0] sm:$0xff]  ;;  %v1169_v5 = vld [vmem:[#allocation7 + $0x110] sm:$0xff]  ;;  %v1186_v7 = vld [vmem:[#allocation7 + $0x198] sm:$0xff] }
  0x23   :  { %775 = vmatpush.bf16.msra.mxu2 %v1157_v25  ;;  %v1177_v6 = vld [vmem:[#allocation7 + $0x150] sm:$0xff]  ;;  %v1194_v8 = vld [vmem:[#allocation7 + $0x1d8] sm:$0xff]  ;;  %v1176_v10 = vld [vmem:[#allocation7 + $0x148] sm:$0xff] }
  0x24   :  { %788 = vmatpush.bf16.msra.mxu3 %v1165_v26  ;;  %v1185_v11 = vld [vmem:[#allocation7 + $0x190] sm:$0xff]  ;;  %v1167_v13 = vld [vmem:[#allocation7 + $0x100] sm:$0xff]  ;;  %v1184_v15 = vld [vmem:[#allocation7 + $0x188] sm:$0xff] }
  0x25   :  { %749 = vmatpush.bf16.msra.mxu0 %v1141_v23  ;;  %762 = vmatpush.bf16.msra.mxu1 %v1149_v24  ;;  %v1193_v12 = vld [vmem:[#allocation7 + $0x1d0] sm:$0xff]  ;;  %v1175_v14 = vld [vmem:[#allocation7 + $0x140] sm:$0xff]  ;;  %v1192_v16 = vld [vmem:[#allocation7 + $0x1c8] sm:$0xff] }
  0x26   :  { %v1183_v17 = vld [vmem:[#allocation7 + $0x180] sm:$0xff]  ;;  %v68_v19 = vld [vmem:[#allocation5] sm:$0xff] }
  0x27   :  { %776 = vmatpush.bf16.msra.mxu2 %v1156_v29  ;;  %v1191_v18 = vld [vmem:[#allocation7 + $0x1c0] sm:$0xff]  ;;  %v70_v20 = vperm.slane %v68_v19, 0  ;;  %v71_v21 = vperm.slane %v68_v19, 1 }
  0x28   :  { %789 = vmatpush.bf16.msra.mxu3 %v1164_v30 }
  0x29   :  { %750 = vmatpush.bf16.msra.mxu0 %v1140_v27  ;;  %763 = vmatpush.bf16.msra.mxu1 %v1148_v28  ;;  %v72_v27 = vperm.slane %v68_v19, 2  ;;  %v73_v28 = vperm.slane %v68_v19, 3 }
  0x2a   :  { %875 = vmatmul.msk.bf16.vlgmr.msrb.gmra.mxu0 %vm99_vm1, %v65_v9  ;;  %877 = vmatmul.msk.bf16.vlgmr.msrb.gmra.mxu2 %vm99_vm1, %v65_v9 }
  0x2b   :  { %878 = vmatmul.msk.bf16.vlgmr.msrb.gmra.mxu3 %vm99_vm1, %v65_v9  ;;  %777 = vmatpush.bf16.msra.mxu2 %v1155_v32 }
  0x2c   :  { %876 = vmatmul.msk.bf16.vlgmr.msrb.gmra.mxu1 %vm99_vm1, %v65_v9  ;;  %790 = vmatpush.bf16.msra.mxu3 %v1163_v34  ;;  %v1168_v9 = vld [vmem:[#allocation7 + $0x108] sm:$0xff] }
  0x2d   :  { %751 = vmatpush.bf16.msra.mxu0 %v1139_v31  ;;  %764 = vmatpush.bf16.msra.mxu1 %v1147_v33 }
  0x2f   :  { %778 = vmatpush.bf16.msra.mxu2 %v1154_v36 }
  0x30   :  { %791 = vmatpush.bf16.msra.mxu3 %v1162_v38  ;;  %v74_v38 = vperm.slane %v68_v19, 4 }
  0x31   :  { %752 = vmatpush.bf16.msra.mxu0 %v1138_v35  ;;  %765 = vmatpush.bf16.msra.mxu1 %v1146_v37 }
  0x33   :  { %779 = vmatpush.bf16.msra.mxu2 %v1153_v40 }
  0x34   :  { %792 = vmatpush.bf16.msra.mxu3 %v1161_v42 }
  0x35   :  { %753 = vmatpush.bf16.msra.mxu0 %v1137_v39  ;;  %766 = vmatpush.bf16.msra.mxu1 %v1145_v41  ;;  %v75_v41 = vperm.slane %v68_v19, 5 }
  0x37   :  { %780 = vmatpush.bf16.msra.mxu2 %v1152_v44 }
  0x38   :  { %793 = vmatpush.bf16.msra.mxu3 %v1160_v46 }
  0x39   :  { %754 = vmatpush.bf16.msra.mxu0 %v1136_v43  ;;  %767 = vmatpush.bf16.msra.mxu1 %v1144_v45 }
  0x3b   :  { %781 = vmatpush.bf16.msra.mxu2 %v1151_v49 }
  0x3c   :  { %794 = vmatpush.bf16.msra.mxu3 %v1159_v51 }
  0x3d   :  { %755 = vmatpush.bf16.msra.mxu0 %v1135_v47  ;;  %768 = vmatpush.bf16.msra.mxu1 %v1143_v50  ;;  %v76_v47 = vperm.slane %v68_v19, 6 }
  0x3f   :  { %826 = vmatpush.bf16.msrb.mxu2 %v1190_v53 }
  0x40   :  { %839 = vmatpush.bf16.msrb.mxu3 %v1198_v54 }
  0x41   :  { %800 = vmatpush.bf16.msrb.mxu0 %v1174_v48  ;;  %813 = vmatpush.bf16.msrb.mxu1 %v1182_v52  ;;  %v77_v48 = vperm.slane %v68_v19, 7 }
  0x43   :  { %827 = vmatpush.bf16.msrb.mxu2 %v1189_v59 }
  0x44   :  { %840 = vmatpush.bf16.msrb.mxu3 %v1197_v60 }
  0x45   :  { %801 = vmatpush.bf16.msrb.mxu0 %v1173_v55  ;;  %814 = vmatpush.bf16.msrb.mxu1 %v1181_v56 }
  0x47   :  { %828 = vmatpush.bf16.msrb.mxu2 %v1188_v63 }
  0x48   :  { %841 = vmatpush.bf16.msrb.mxu3 %v1196_v0 }
  0x49   :  { %802 = vmatpush.bf16.msrb.mxu0 %v1172_v57  ;;  %815 = vmatpush.bf16.msrb.mxu1 %v1180_v58 }
  0x4b   :  { %829 = vmatpush.bf16.msrb.mxu2 %v1187_v3 }
  0x4c   :  { %842 = vmatpush.bf16.msrb.mxu3 %v1195_v4 }
  0x4d   :  { %803 = vmatpush.bf16.msrb.mxu0 %v1171_v61  ;;  %816 = vmatpush.bf16.msrb.mxu1 %v1179_v62  ;;  %v1205_v62 = vld [vmem:[%s1382_s4] ss:$0 sm:$0xff] }
  0x4f   :  { %830 = vmatpush.bf16.msrb.mxu2 %v1186_v7 }
  0x50   :  { %843 = vmatpush.bf16.msrb.mxu3 %v1194_v8 }
  0x51   :  { %804 = vmatpush.bf16.msrb.mxu0 %v1170_v1  ;;  %817 = vmatpush.bf16.msrb.mxu1 %v1178_v2 }
  0x53   :  { %831 = vmatpush.bf16.msrb.mxu2 %v1185_v11 }
  0x54   :  { %844 = vmatpush.bf16.msrb.mxu3 %v1193_v12 }
  0x55   :  { %805 = vmatpush.bf16.msrb.mxu0 %v1169_v5  ;;  %818 = vmatpush.bf16.msrb.mxu1 %v1177_v6 }
  0x57   :  { %832 = vmatpush.bf16.msrb.mxu2 %v1184_v15 }
  0x58   :  { %845 = vmatpush.bf16.msrb.mxu3 %v1192_v16 }
  0x59   :  { %806 = vmatpush.bf16.msrb.mxu0 %v1168_v9  ;;  %819 = vmatpush.bf16.msrb.mxu1 %v1176_v10 }
  0x5b   :  { %833 = vmatpush.bf16.msrb.mxu2 %v1183_v17 }
  0x5c   :  { %846 = vmatpush.bf16.msrb.mxu3 %v1191_v18 }
  0x5d   :  { %807 = vmatpush.bf16.msrb.mxu0 %v1167_v13  ;;  %820 = vmatpush.bf16.msrb.mxu1 %v1175_v14 }
  0x97   :  { %v129_v22 = vpop.f32.mrf.mxu0 }
  0x98   :  { %v130_v23 = vadd.f32 %v129_v22, %v70_v20 }
  0x99   :  { %v142_v24 = vpop.f32.mrf.mxu1 }
  0x9a   :  { %v224_v25 = vpack.c.bf16 %v130_v23, %v130_v23  ;;  %v143_v26 = vadd.f32 %v142_v24, %v71_v21 }
  0x9c   :  { %v225_v29 = vpack.c.bf16 %v143_v26, %v143_v26  ;;  %756 = vmatmul.bf16.vlgmr.msra.gmra.mxu0 %v224_v25 }
  0x9d   :  { %v155_v30 = vpop.f32.mrf.mxu2 }
  0x9e   :  { %v156_v31 = vadd.f32 %v155_v30, %v72_v27  ;;  %v168_v32 = vpop.f32.mrf.mxu3  ;;  %769 = vmatmul.bf16.vlgmr.msra.gmra.mxu1 %v225_v29 }
  0x9f   :  { %v169_v33 = vadd.f32 %v168_v32, %v73_v28  ;;  %v131_v34 = vpop.f32.mrf.mxu0 }
  0xa0   :  { %v226_v35 = vpack.c.bf16 %v156_v31, %v156_v31 }
  0xa1   :  { %v227_v36 = vpack.c.bf16 %v169_v33, %v169_v33  ;;  %v144_v37 = vpop.f32.mrf.mxu1 }
  0xa2   :  { %782 = vmatmul.bf16.vlgmr.msra.gmra.mxu2 %v226_v35 }
  0xa3   :  { %795 = vmatmul.bf16.vlgmr.msra.gmra.mxu3 %v227_v36 }
  0xa5   :  { %v157_v39 = vpop.f32.mrf.mxu2 }
  0xa6   :  { %v170_v40 = vpop.f32.mrf.mxu3 }
  0xa7   :  { %v181_v42 = vpop.f32.mrf.mxu0 }
  0xa8   :  { %v182_v43 = vadd.f32 %v181_v42, %v74_v38 }
  0xa9   :  { %v194_v44 = vpop.f32.mrf.mxu1 }
  0xaa   :  { %v228_v45 = vpack.c.bf16 %v182_v43, %v182_v43  ;;  %v195_v46 = vadd.f32 %v194_v44, %v75_v41 }
  0xac   :  { %v229_v49 = vpack.c.bf16 %v195_v46, %v195_v46  ;;  %808 = vmatmul.bf16.vlgmr.msrb.gmra.mxu0 %v228_v45 }
  0xad   :  { %v207_v50 = vpop.f32.mrf.mxu2 }
  0xae   :  { %v208_v51 = vadd.f32 %v207_v50, %v76_v47  ;;  %v220_v52 = vpop.f32.mrf.mxu3  ;;  %821 = vmatmul.bf16.vlgmr.msrb.gmra.mxu1 %v229_v49 }
  0xaf   :  { %v221_v53 = vadd.f32 %v220_v52, %v77_v48  ;;  %v183_v54 = vpop.f32.mrf.mxu0 }
  0xb0   :  { %v230_v55 = vpack.c.bf16 %v208_v51, %v208_v51 }
  0xb1   :  { %v231_v56 = vpack.c.bf16 %v221_v53, %v221_v53  ;;  %v196_v57 = vpop.f32.mrf.mxu1 }
  0xb2   :  { %834 = vmatmul.bf16.vlgmr.msrb.gmra.mxu2 %v230_v55 }
  0xb3   :  { %847 = vmatmul.bf16.vlgmr.msrb.gmra.mxu3 %v231_v56 }
  0xb5   :  { %v209_v58 = vpop.f32.mrf.mxu2 }
  0xb6   :  { %v222_v59 = vpop.f32.mrf.mxu3 }
 0x119   :  { %v757_v60 = vpop.f32.mrf.mxu0 }
 0x11a   :  { %v758_v63 = vadd.f32 %v1205_v62, %v757_v60 }
 0x11b   :  { %v770_v61 = vpop.f32.mrf.mxu1 }
 0x11c   :  { %v771_v2 = vadd.f32 %v770_v61, %v758_v63 }
 0x121   :  { %v759_v0 = vpop.f32.mrf.mxu0 }
 0x123   :  { %v772_v1 = vpop.f32.mrf.mxu1 }
 0x125   :  { %v783_v3 = vpop.f32.mrf.mxu2 }
 0x126   :  { %v796_v4 = vpop.f32.mrf.mxu3  ;;  %v784_v5 = vadd.f32 %v783_v3, %v771_v2 }
 0x128   :  { %v797_v8 = vadd.f32 %v796_v4, %v784_v5 }
 0x129   :  { %v809_v6 = vpop.f32.mrf.mxu0 }
 0x12a   :  { %v810_v11 = vadd.f32 %v809_v6, %v797_v8 }
 0x12b   :  { %v822_v7 = vpop.f32.mrf.mxu1 }
 0x12c   :  { %v823_v14 = vadd.f32 %v822_v7, %v810_v11 }
 0x12d   :  { %v785_v9 = vpop.f32.mrf.mxu2 }
 0x12e   :  { %v798_v10 = vpop.f32.mrf.mxu3 }
 0x131   :  { %v811_v12 = vpop.f32.mrf.mxu0 }
 0x133   :  { %v824_v13 = vpop.f32.mrf.mxu1 }
 0x135   :  { %v835_v15 = vpop.f32.mrf.mxu2 }
 0x136   :  { %v836_v16 = vadd.f32 %v835_v15, %v823_v14  ;;  %v848_v17 = vpop.f32.mrf.mxu3 }
 0x138   :  { %v849_v18 = vadd.f32 %v848_v17, %v836_v16 }
 0x13a   :  { %852 = vst [vmem:[#allocation8] sm:$0xff] %v849_v18 }
 0x13b   :  { %863 = dma.vmem_to_hbm [thread:$0]  %s859_s11, 128, %s861_s13, [#allocation4]  }
 0x13d   :  { %v837_v19 = vpop.f32.mrf.mxu2 }
 0x13e   :  { %v850_v20 = vpop.f32.mrf.mxu3 }
 0x13f   :  { %1306 = dma.done.wait [#allocation4], 128  }
 0x140   :  { %1307 = vsyncadd [#allocation4], 4294967168 }
 0x141   :  { %868 = vsyncpa [#allocation3], 1 }
 0x142   :  { %869 = vsyncpa [#allocation6], 1 }
 0x143   :  { %870 = vsyncpa [#allocation4], 1 }

</bundles_post_ra>
